<compile_context>
chip_gen: v6e
topology: v6e:2x2x1
jax: 0.10.0
libtpu: 0.0.40
codegen_flags: <defaults>
</compile_context>

<pallas_src>
import functools
import math

import numpy as np
import jax
import jax.numpy as jnp
from jax.experimental import pallas as pl
from jax.experimental.pallas import tpu as pltpu

# ----------------------------- hyperparameters ------------------------------
K_SIGN = 1000.0     # self.k
EPSILON = 5.0       # self.epsilon
HYPER1 = 2          # fixed-point iterations in refine (host early-exit dropped;
                    # the refine map is idempotent at a fixed point)
HYPER2 = 0.25       # fraction of individualization vectors kept per target cell
B_TILE = 8          # candidates refined per grid step


def _f5(dsum, num_nodes, alpha, beta):
    # TODO(synk): DynamicTrainableStepFunctionF5 definition was not provided;
    # deterministic stand-in: trainable sigmoid step scaled to [0, num_nodes).
    return num_nodes * jax.nn.sigmoid(alpha * dsum + beta)


# --------------------------------- kernel -------------------------------------
def _refine_fused_kernel(params_ref, x_ref, at_hbm_ref, p_ref, inv_ref, at_vmem,
                         *, is_info):
    """Fused refine for B_TILE candidates: [pairwise init] + (HYPER1+1) refine
    iterations + invariant.

    params_ref (SMEM f32[8]): [w_nbr, w_self, bias, alpha, beta,
                               inv_w_nbr, inv_w_self, inv_bias]
    x_ref:      VMEM [B_TILE, N]  candidate node-value rows (lane-dense)
    at_hbm_ref: ANY  [N, N] bf16  adjacency^T (single HBM operand)
    p_ref:      VMEM [B_TILE, N]  refined partitions (lane-dense output)
    inv_ref:    VMEM [B_TILE, 1]  invariants  sum_i InfoCollect_inv(p)[b, i]
    at_vmem:    VMEM [N, N] bf16  single-buffered adjacency scratch
    """
    n = at_vmem.shape[0]
    w_nbr, w_self, bias = params_ref[0], params_ref[1], params_ref[2]
    alpha, beta = params_ref[3], params_ref[4]
    iw_nbr, iw_self, ibias = params_ref[5], params_ref[6], params_ref[7]

    # Single-buffered adjacency: copy HBM -> VMEM once, at grid step 0.  The
    # grid axis is "arbitrary" (sequential on one core) so step 0 always runs
    # before the others; parallel-vs-arbitrary is measured perf-neutral.
    @pl.when(pl.program_id(0) == 0)
    def _():
        pltpu.sync_copy(at_hbm_ref, at_vmem)

    at = at_vmem[...]                                        # [N, N] bf16

    def pairwise_f5(x):
        # dsum[b, i] = sum_j tanh(k*(x[b,i] - x[b,j]) - eps), computed as N
        # lane-broadcast strips -> no N x N intermediate, no eye mask.
        # TODO(synk): static strip loop is fine at demo N; for large N switch
        # to a row-tiled [TILE_M, N] blocked pairwise pass.
        # TODO(synk): cast the tanh input to bf16 on v6e/v7x (~2x EUP) once
        # numerics are validated; kept f32 here (portable to v5e).
        kx = K_SIGN * x                                      # [B, N]
        kxe = kx - EPSILON
        dsum = jnp.zeros_like(x)
        for j in range(n):
            dsum = dsum + jnp.tanh(kxe - kx[:, j:j + 1])
        return _f5(dsum, float(n), alpha, beta)

    def info_collect(p, wn, ws, b):
        # TODO(synk): InfoCollect definition was not provided; deterministic
        # 1->1 message-passing stand-in agg[b,i] = sum_j adj[i,j] * p[b,j],
        # one [B_TILE, N] @ [N, N] bf16 MXU matmul (at == adj.T).
        agg = jnp.dot(p.astype(jnp.bfloat16), at,
                      preferred_element_type=jnp.float32)    # [B, N] f32
        return wn * agg + ws * p + b

    p = x_ref[...]                                           # [B, N]
    if is_info:
        # refine(is_info=True) first step: D = x - x.T; sign; row-sum; f5.
        p = pairwise_f5(p)

    for _ in range(HYPER1 + 1):
        xr = info_collect(p, w_nbr, w_self, bias)
        # TODO(synk): PyTorch does X.half(); bf16 round-trip is the TPU-native
        # precision-reduction stand-in.
        xr = xr.astype(jnp.bfloat16).astype(jnp.float32)
        p = pairwise_f5(xr)

    # Fused invariant (previously a separate inv_sum pallas_call per partition).
    x_inv = info_collect(p, iw_nbr, iw_self, ibias)
    p_ref[...] = p
    inv_ref[...] = jnp.sum(x_inv, axis=1, keepdims=True)     # [B, 1]


# --------------------------- pallas_call wrapper ------------------------------
def _refine_call(params, cands, at_bf16, *, is_info):
    """cands: [B_pad, N] f32 with B_pad % B_TILE == 0; at_bf16: [N, N] bf16."""
    b_pad, n = cands.shape
    assert b_pad % B_TILE == 0
    return pl.pallas_call(
        functools.partial(_refine_fused_kernel, is_info=is_info),
        grid=(b_pad // B_TILE,),
        out_shape=(jax.ShapeDtypeStruct((b_pad, n), jnp.float32),
                   jax.ShapeDtypeStruct((b_pad, 1), jnp.float32)),
        in_specs=[pl.BlockSpec(memory_space=pltpu.MemorySpace.SMEM),
                  pl.BlockSpec((B_TILE, n), lambda i: (i, 0)),
                  pl.BlockSpec(memory_space=pl.ANY)],        # adj^T stays in HBM
        out_specs=(pl.BlockSpec((B_TILE, n), lambda i: (i, 0)),
                   pl.BlockSpec((B_TILE, 1), lambda i: (i, 0))),
        scratch_shapes=[pltpu.VMEM((n, n), jnp.bfloat16)],   # single adj buffer
        compiler_params=pltpu.CompilerParams(
            # "arbitrary" keeps the copy-once guard correct on multi-TC chips;
            # measured perf delta vs "parallel" is ~0.
            # TODO(synk): on v7x, consider CORE_PARALLEL on the batch axis once
            # per-candidate work is large enough (and hoist the adj copy).
            dimension_semantics=("arbitrary",),
            vmem_limit_bytes=32 * 1024 * 1024),
    )(params, cands, at_bf16)


refine_init = jax.jit(functools.partial(_refine_call, is_info=True))
refine_batch = jax.jit(functools.partial(_refine_call, is_info=False))


# ------------------------------ host-side glue --------------------------------
def _target_cell_indices(partition):
    """Indices of the most common label; ties broken toward the max label value
    (matches ExactModel.target_cell), vectorized with numpy."""
    vals, counts = np.unique(partition, return_counts=True)
    modes = vals[counts == counts.max()]
    target = modes.max()
    return np.nonzero(partition == target)[0]


def _one_hot_rows(indices, n):
    oh = np.zeros((len(indices), n), np.float32)
    if len(indices):
        oh[np.arange(len(indices)), indices] = 1.0
    return oh


def _pad_batch(batch):
    b = batch.shape[0]
    b_pad = ((b + B_TILE - 1) // B_TILE) * B_TILE
    if b_pad != b:
        batch = np.concatenate(
            [batch, np.repeat(batch[-1:], b_pad - b, axis=0)], axis=0)
    return batch, b


def approx_gnn_forward(x, adj, params):
    """approxGNN / ExactModel forward.  x: [N, 1] node features, adj: dense [N, N]."""
    n = x.shape[0]
    at_bf = jnp.asarray(adj, jnp.bfloat16).T      # single adj^T operand; 0/1 exact in bf16
    x_np = np.asarray(x, np.float32).reshape(1, n)

    # ONE fused pallas_call: pairwise init + refine loop + invariant of p_0.
    x_batch = jnp.asarray(np.repeat(x_np, B_TILE, axis=0))
    p0, inv0 = refine_init(params, x_batch, at_bf)
    p0_host, inv0_host = jax.device_get((p0, inv0))
    p0_host = p0_host[0]
    max_inv = float(inv0_host[0, 0])

    # TODO(synk): the BFS-style individualization-refinement tree search
    # (refine_partition / essential-info bookkeeping in the original) is
    # data-dependent host control flow; each layer runs ONE batched
    # pallas_call and does ONE device->host transfer.
    current_parts = [p0_host]
    current_invs = [max_inv]
    layer_num = 0
    while current_parts and layer_num <= 2:
        layer_num += 1
        cand_rows = []
        for part, cinv in zip(current_parts, current_invs):
            if cinv < max_inv:          # prune against the in-layer running best
                continue
            max_inv = cinv              # mirrors the original's in-layer base_score update
            idxs = _target_cell_indices(part)
            keep = math.ceil(HYPER2 * len(idxs))
            cand_rows.append(part[None, :] + _one_hot_rows(idxs[:keep], n))  # p_tempt
        if not cand_rows:
            break
        batch_np, b = _pad_batch(np.concatenate(cand_rows, axis=0))
        pb, ib = refine_batch(params, jnp.asarray(batch_np), at_bf)   # ONE call per layer
        pb_host, ib_host = jax.device_get((pb, ib))                   # ONE sync per layer
        current_parts = list(pb_host[:b])
        current_invs = [float(v) for v in ib_host[:b, 0]]
    return jnp.asarray([max_inv], jnp.float32)


# ---------------------------------- main ---------------------------------------
if __name__ == "__main__":
    N = 16  # number of graph nodes (data.x.shape[0]); node feature dim = 1

    # deterministic example inputs
    key = jax.random.PRNGKey(0)
    kx, ka = jax.random.split(key)
    x = jax.random.normal(kx, (N, 1), dtype=jnp.float32)          # data.x
    probs = jax.random.uniform(ka, (N, N))
    adj_b = probs < 0.3
    adj_b = jnp.logical_or(adj_b, adj_b.T)
    adj_b = jnp.logical_and(adj_b, ~jnp.eye(N, dtype=bool))
    adj = adj_b.astype(jnp.float32)                               # dense edge_index

    # deterministic parameter init (InfoCollect local/inv: 1->1; f5: alpha, beta)
    wkey = jax.random.PRNGKey(42)
    w = jax.random.uniform(wkey, (6,), minval=-0.5, maxval=0.5, dtype=jnp.float32)
    alpha, beta = jnp.float32(0.25), jnp.float32(0.1)
    # params: [w_nbr, w_self, bias, alpha, beta, inv_w_nbr, inv_w_self, inv_bias]
    params = jnp.array([w[0], w[1], w[2], alpha, beta, w[3], w[4], w[5]],
                       jnp.float32)

    # Smoke-test the batched fused-refine kernel directly (one B_TILE block).
    at_bf = jnp.asarray(adj, jnp.bfloat16).T
    cand = jnp.stack([x[:, 0] + 0.1 * i for i in range(B_TILE)])  # [B_TILE, N]
    pb, ib = refine_batch(params, cand, at_bf)
    jax.block_until_ready((pb, ib))

    max_inv = approx_gnn_forward(x, adj, params)
    jax.block_until_ready(max_inv)
    print("KERNEL_OK")
</pallas_src>

<mosaic_0001>
module attributes {stable_mosaic.version = 11 : i64} {
  func.func @_refine_fused_kernel(%arg0: i32, %arg1: memref<8xf32, #tpu.memory_space<smem>>, %arg2: memref<8x16xf32, #tpu.memory_space<vmem>>, %arg3: memref<16x16xbf16, #tpu.memory_space<any>>, %arg4: memref<8x16xf32, #tpu.memory_space<vmem>>, %arg5: memref<8x1xf32, #tpu.memory_space<vmem>>, %arg6: memref<16x16xbf16, #tpu.memory_space<vmem>>) attributes {dimension_semantics = [#tpu.dimension_semantics<arbitrary>], iteration_bounds = array<i64: 1>, scalar_prefetch = 0 : i64, scratch_operands = 1 : i64, tpu.core_type = #tpu.core_type<tc>, window_params = [{transform_indices = @transform_0, window_bounds = array<i64: 8>}, {transform_indices = @transform_1, window_bounds = array<i64: 8, 16>}, {}, {transform_indices = @transform_3, window_bounds = array<i64: 8, 16>}, {transform_indices = @transform_4, window_bounds = array<i64: 8, 1>}]} {
    %c0 = arith.constant 0 : index
    %0 = memref.load %arg1[%c0] : memref<8xf32, #tpu.memory_space<smem>>
    %c1 = arith.constant 1 : index
    %1 = memref.load %arg1[%c1] : memref<8xf32, #tpu.memory_space<smem>>
    %c2 = arith.constant 2 : index
    %2 = memref.load %arg1[%c2] : memref<8xf32, #tpu.memory_space<smem>>
    %c3 = arith.constant 3 : index
    %3 = memref.load %arg1[%c3] : memref<8xf32, #tpu.memory_space<smem>>
    %c4 = arith.constant 4 : index
    %4 = memref.load %arg1[%c4] : memref<8xf32, #tpu.memory_space<smem>>
    %c5 = arith.constant 5 : index
    %5 = memref.load %arg1[%c5] : memref<8xf32, #tpu.memory_space<smem>>
    %c6 = arith.constant 6 : index
    %6 = memref.load %arg1[%c6] : memref<8xf32, #tpu.memory_space<smem>>
    %c7 = arith.constant 7 : index
    %7 = memref.load %arg1[%c7] : memref<8xf32, #tpu.memory_space<smem>>
    %c0_i32 = arith.constant 0 : i32
    %8 = arith.cmpi eq, %arg0, %c0_i32 : i32
    %9 = arith.extui %8 : i1 to i32
    %c0_i32_0 = arith.constant 0 : i32
    %10 = arith.cmpi ne, %9, %c0_i32_0 : i32
    scf.if %10 {
      "tpu.region"() ({
        %347 = tpu.sem_alloc : memref<!tpu.dma_semaphore, #tpu.memory_space<semaphore_mem>>
        tpu.enqueue_dma source(%arg3 : memref<16x16xbf16, #tpu.memory_space<any>>) target(%arg6 : memref<16x16xbf16, #tpu.memory_space<vmem>>) target_semaphore(%347 : memref<!tpu.dma_semaphore, #tpu.memory_space<semaphore_mem>>)
        tpu.wait_dma2 semaphore(%347 : memref<!tpu.dma_semaphore, #tpu.memory_space<semaphore_mem>>) src(%arg3 : memref<16x16xbf16, #tpu.memory_space<any>>) dst(%arg6 : memref<16x16xbf16, #tpu.memory_space<vmem>>)
        tpu.yield
      }) : () -> ()
    } else {
    }
    %c0_1 = arith.constant 0 : index
    %c0_2 = arith.constant 0 : index
    %11 = vector.load %arg6[%c0_1, %c0_2] : memref<16x16xbf16, #tpu.memory_space<vmem>>, vector<16x16xbf16>
    %c0_3 = arith.constant 0 : index
    %c0_4 = arith.constant 0 : index
    %12 = vector.load %arg2[%c0_3, %c0_4] : memref<8x16xf32, #tpu.memory_space<vmem>>, vector<8x16xf32>
    %13 = arith.truncf %12 : vector<8x16xf32> to vector<8x16xbf16>
    %cst = arith.constant dense<0.000000e+00> : vector<8x16xf32>
    %14 = tpu.matmul %13, %11, %cst {dimension_numbers = #tpu.dot_dimension_numbers<[1], [0], [0], [1], [0, 0, 1, 1], [], []>} : vector<8x16xbf16>, vector<16x16xbf16>, vector<8x16xf32> -> vector<8x16xf32>
    %15 = vector.broadcast %0 : f32 to vector<8x16xf32>
    %16 = arith.mulf %15, %14 : vector<8x16xf32>
    %17 = vector.broadcast %1 : f32 to vector<8x16xf32>
    %18 = arith.mulf %17, %12 : vector<8x16xf32>
    %19 = arith.addf %16, %18 : vector<8x16xf32>
    %20 = vector.broadcast %2 : f32 to vector<8x16xf32>
    %21 = arith.addf %19, %20 : vector<8x16xf32>
    %22 = arith.truncf %21 : vector<8x16xf32> to vector<8x16xbf16>
    %23 = arith.extf %22 : vector<8x16xbf16> to vector<8x16xf32>
    %cst_5 = arith.constant 1.000000e+03 : f32
    %24 = vector.broadcast %cst_5 : f32 to vector<8x16xf32>
    %25 = arith.mulf %24, %23 : vector<8x16xf32>
    %cst_6 = arith.constant 5.000000e+00 : f32
    %26 = vector.broadcast %cst_6 : f32 to vector<8x16xf32>
    %27 = arith.subf %25, %26 : vector<8x16xf32>
    %cst_7 = arith.constant 0.000000e+00 : f32
    %28 = vector.broadcast %cst_7 : f32 to vector<8x16xf32>
    %29 = vector.extract_strided_slice %25 {offsets = [0, 0], sizes = [8, 1], strides = [1, 1]} : vector<8x16xf32> to vector<8x1xf32>
    %30 = vector.broadcast %29 : vector<8x1xf32> to vector<8x16xf32>
    %31 = arith.subf %27, %30 : vector<8x16xf32>
    %32 = math.tanh %31 : vector<8x16xf32>
    %33 = arith.addf %28, %32 : vector<8x16xf32>
    %34 = vector.extract_strided_slice %25 {offsets = [0, 1], sizes = [8, 1], strides = [1, 1]} : vector<8x16xf32> to vector<8x1xf32>
    %35 = vector.broadcast %34 : vector<8x1xf32> to vector<8x16xf32>
    %36 = arith.subf %27, %35 : vector<8x16xf32>
    %37 = math.tanh %36 : vector<8x16xf32>
    %38 = arith.addf %33, %37 : vector<8x16xf32>
    %39 = vector.extract_strided_slice %25 {offsets = [0, 2], sizes = [8, 1], strides = [1, 1]} : vector<8x16xf32> to vector<8x1xf32>
    %40 = vector.broadcast %39 : vector<8x1xf32> to vector<8x16xf32>
    %41 = arith.subf %27, %40 : vector<8x16xf32>
    %42 = math.tanh %41 : vector<8x16xf32>
    %43 = arith.addf %38, %42 : vector<8x16xf32>
    %44 = vector.extract_strided_slice %25 {offsets = [0, 3], sizes = [8, 1], strides = [1, 1]} : vector<8x16xf32> to vector<8x1xf32>
    %45 = vector.broadcast %44 : vector<8x1xf32> to vector<8x16xf32>
    %46 = arith.subf %27, %45 : vector<8x16xf32>
    %47 = math.tanh %46 : vector<8x16xf32>
    %48 = arith.addf %43, %47 : vector<8x16xf32>
    %49 = vector.extract_strided_slice %25 {offsets = [0, 4], sizes = [8, 1], strides = [1, 1]} : vector<8x16xf32> to vector<8x1xf32>
    %50 = vector.broadcast %49 : vector<8x1xf32> to vector<8x16xf32>
    %51 = arith.subf %27, %50 : vector<8x16xf32>
    %52 = math.tanh %51 : vector<8x16xf32>
    %53 = arith.addf %48, %52 : vector<8x16xf32>
    %54 = vector.extract_strided_slice %25 {offsets = [0, 5], sizes = [8, 1], strides = [1, 1]} : vector<8x16xf32> to vector<8x1xf32>
    %55 = vector.broadcast %54 : vector<8x1xf32> to vector<8x16xf32>
    %56 = arith.subf %27, %55 : vector<8x16xf32>
    %57 = math.tanh %56 : vector<8x16xf32>
    %58 = arith.addf %53, %57 : vector<8x16xf32>
    %59 = vector.extract_strided_slice %25 {offsets = [0, 6], sizes = [8, 1], strides = [1, 1]} : vector<8x16xf32> to vector<8x1xf32>
    %60 = vector.broadcast %59 : vector<8x1xf32> to vector<8x16xf32>
    %61 = arith.subf %27, %60 : vector<8x16xf32>
    %62 = math.tanh %61 : vector<8x16xf32>
    %63 = arith.addf %58, %62 : vector<8x16xf32>
    %64 = vector.extract_strided_slice %25 {offsets = [0, 7], sizes = [8, 1], strides = [1, 1]} : vector<8x16xf32> to vector<8x1xf32>
    %65 = vector.broadcast %64 : vector<8x1xf32> to vector<8x16xf32>
    %66 = arith.subf %27, %65 : vector<8x16xf32>
    %67 = math.tanh %66 : vector<8x16xf32>
    %68 = arith.addf %63, %67 : vector<8x16xf32>
    %69 = vector.extract_strided_slice %25 {offsets = [0, 8], sizes = [8, 1], strides = [1, 1]} : vector<8x16xf32> to vector<8x1xf32>
    %70 = vector.broadcast %69 : vector<8x1xf32> to vector<8x16xf32>
    %71 = arith.subf %27, %70 : vector<8x16xf32>
    %72 = math.tanh %71 : vector<8x16xf32>
    %73 = arith.addf %68, %72 : vector<8x16xf32>
    %74 = vector.extract_strided_slice %25 {offsets = [0, 9], sizes = [8, 1], strides = [1, 1]} : vector<8x16xf32> to vector<8x1xf32>
    %75 = vector.broadcast %74 : vector<8x1xf32> to vector<8x16xf32>
    %76 = arith.subf %27, %75 : vector<8x16xf32>
    %77 = math.tanh %76 : vector<8x16xf32>
    %78 = arith.addf %73, %77 : vector<8x16xf32>
    %79 = vector.extract_strided_slice %25 {offsets = [0, 10], sizes = [8, 1], strides = [1, 1]} : vector<8x16xf32> to vector<8x1xf32>
    %80 = vector.broadcast %79 : vector<8x1xf32> to vector<8x16xf32>
    %81 = arith.subf %27, %80 : vector<8x16xf32>
    %82 = math.tanh %81 : vector<8x16xf32>
    %83 = arith.addf %78, %82 : vector<8x16xf32>
    %84 = vector.extract_strided_slice %25 {offsets = [0, 11], sizes = [8, 1], strides = [1, 1]} : vector<8x16xf32> to vector<8x1xf32>
    %85 = vector.broadcast %84 : vector<8x1xf32> to vector<8x16xf32>
    %86 = arith.subf %27, %85 : vector<8x16xf32>
    %87 = math.tanh %86 : vector<8x16xf32>
    %88 = arith.addf %83, %87 : vector<8x16xf32>
    %89 = vector.extract_strided_slice %25 {offsets = [0, 12], sizes = [8, 1], strides = [1, 1]} : vector<8x16xf32> to vector<8x1xf32>
    %90 = vector.broadcast %89 : vector<8x1xf32> to vector<8x16xf32>
    %91 = arith.subf %27, %90 : vector<8x16xf32>
    %92 = math.tanh %91 : vector<8x16xf32>
    %93 = arith.addf %88, %92 : vector<8x16xf32>
    %94 = vector.extract_strided_slice %25 {offsets = [0, 13], sizes = [8, 1], strides = [1, 1]} : vector<8x16xf32> to vector<8x1xf32>
    %95 = vector.broadcast %94 : vector<8x1xf32> to vector<8x16xf32>
    %96 = arith.subf %27, %95 : vector<8x16xf32>
    %97 = math.tanh %96 : vector<8x16xf32>
    %98 = arith.addf %93, %97 : vector<8x16xf32>
    %99 = vector.extract_strided_slice %25 {offsets = [0, 14], sizes = [8, 1], strides = [1, 1]} : vector<8x16xf32> to vector<8x1xf32>
    %100 = vector.broadcast %99 : vector<8x1xf32> to vector<8x16xf32>
    %101 = arith.subf %27, %100 : vector<8x16xf32>
    %102 = math.tanh %101 : vector<8x16xf32>
    %103 = arith.addf %98, %102 : vector<8x16xf32>
    %104 = vector.extract_strided_slice %25 {offsets = [0, 15], sizes = [8, 1], strides = [1, 1]} : vector<8x16xf32> to vector<8x1xf32>
    %105 = vector.broadcast %104 : vector<8x1xf32> to vector<8x16xf32>
    %106 = arith.subf %27, %105 : vector<8x16xf32>
    %107 = math.tanh %106 : vector<8x16xf32>
    %108 = arith.addf %103, %107 : vector<8x16xf32>
    %109 = vector.broadcast %3 : f32 to vector<8x16xf32>
    %110 = arith.mulf %109, %108 : vector<8x16xf32>
    %111 = vector.broadcast %4 : f32 to vector<8x16xf32>
    %112 = arith.addf %110, %111 : vector<8x16xf32>
    %113 = arith.negf %112 : vector<8x16xf32>
    %114 = math.exp %113 : vector<8x16xf32>
    %cst_8 = arith.constant 1.000000e+00 : f32
    %115 = vector.broadcast %cst_8 : f32 to vector<8x16xf32>
    %116 = arith.addf %115, %114 : vector<8x16xf32>
    %117 = arith.divf %115, %116 : vector<8x16xf32>
    %cst_9 = arith.constant 1.600000e+01 : f32
    %118 = vector.broadcast %cst_9 : f32 to vector<8x16xf32>
    %119 = arith.mulf %118, %117 : vector<8x16xf32>
    %120 = arith.truncf %119 : vector<8x16xf32> to vector<8x16xbf16>
    %cst_10 = arith.constant dense<0.000000e+00> : vector<8x16xf32>
    %121 = tpu.matmul %120, %11, %cst_10 {dimension_numbers = #tpu.dot_dimension_numbers<[1], [0], [0], [1], [0, 0, 1, 1], [], []>} : vector<8x16xbf16>, vector<16x16xbf16>, vector<8x16xf32> -> vector<8x16xf32>
    %122 = vector.broadcast %0 : f32 to vector<8x16xf32>
    %123 = arith.mulf %122, %121 : vector<8x16xf32>
    %124 = vector.broadcast %1 : f32 to vector<8x16xf32>
    %125 = arith.mulf %124, %119 : vector<8x16xf32>
    %126 = arith.addf %123, %125 : vector<8x16xf32>
    %127 = vector.broadcast %2 : f32 to vector<8x16xf32>
    %128 = arith.addf %126, %127 : vector<8x16xf32>
    %129 = arith.truncf %128 : vector<8x16xf32> to vector<8x16xbf16>
    %130 = arith.extf %129 : vector<8x16xbf16> to vector<8x16xf32>
    %cst_11 = arith.constant 1.000000e+03 : f32
    %131 = vector.broadcast %cst_11 : f32 to vector<8x16xf32>
    %132 = arith.mulf %131, %130 : vector<8x16xf32>
    %cst_12 = arith.constant 5.000000e+00 : f32
    %133 = vector.broadcast %cst_12 : f32 to vector<8x16xf32>
    %134 = arith.subf %132, %133 : vector<8x16xf32>
    %cst_13 = arith.constant 0.000000e+00 : f32
    %135 = vector.broadcast %cst_13 : f32 to vector<8x16xf32>
    %136 = vector.extract_strided_slice %132 {offsets = [0, 0], sizes = [8, 1], strides = [1, 1]} : vector<8x16xf32> to vector<8x1xf32>
    %137 = vector.broadcast %136 : vector<8x1xf32> to vector<8x16xf32>
    %138 = arith.subf %134, %137 : vector<8x16xf32>
    %139 = math.tanh %138 : vector<8x16xf32>
    %140 = arith.addf %135, %139 : vector<8x16xf32>
    %141 = vector.extract_strided_slice %132 {offsets = [0, 1], sizes = [8, 1], strides = [1, 1]} : vector<8x16xf32> to vector<8x1xf32>
    %142 = vector.broadcast %141 : vector<8x1xf32> to vector<8x16xf32>
    %143 = arith.subf %134, %142 : vector<8x16xf32>
    %144 = math.tanh %143 : vector<8x16xf32>
    %145 = arith.addf %140, %144 : vector<8x16xf32>
    %146 = vector.extract_strided_slice %132 {offsets = [0, 2], sizes = [8, 1], strides = [1, 1]} : vector<8x16xf32> to vector<8x1xf32>
    %147 = vector.broadcast %146 : vector<8x1xf32> to vector<8x16xf32>
    %148 = arith.subf %134, %147 : vector<8x16xf32>
    %149 = math.tanh %148 : vector<8x16xf32>
    %150 = arith.addf %145, %149 : vector<8x16xf32>
    %151 = vector.extract_strided_slice %132 {offsets = [0, 3], sizes = [8, 1], strides = [1, 1]} : vector<8x16xf32> to vector<8x1xf32>
    %152 = vector.broadcast %151 : vector<8x1xf32> to vector<8x16xf32>
    %153 = arith.subf %134, %152 : vector<8x16xf32>
    %154 = math.tanh %153 : vector<8x16xf32>
    %155 = arith.addf %150, %154 : vector<8x16xf32>
    %156 = vector.extract_strided_slice %132 {offsets = [0, 4], sizes = [8, 1], strides = [1, 1]} : vector<8x16xf32> to vector<8x1xf32>
    %157 = vector.broadcast %156 : vector<8x1xf32> to vector<8x16xf32>
    %158 = arith.subf %134, %157 : vector<8x16xf32>
    %159 = math.tanh %158 : vector<8x16xf32>
    %160 = arith.addf %155, %159 : vector<8x16xf32>
    %161 = vector.extract_strided_slice %132 {offsets = [0, 5], sizes = [8, 1], strides = [1, 1]} : vector<8x16xf32> to vector<8x1xf32>
    %162 = vector.broadcast %161 : vector<8x1xf32> to vector<8x16xf32>
    %163 = arith.subf %134, %162 : vector<8x16xf32>
    %164 = math.tanh %163 : vector<8x16xf32>
    %165 = arith.addf %160, %164 : vector<8x16xf32>
    %166 = vector.extract_strided_slice %132 {offsets = [0, 6], sizes = [8, 1], strides = [1, 1]} : vector<8x16xf32> to vector<8x1xf32>
    %167 = vector.broadcast %166 : vector<8x1xf32> to vector<8x16xf32>
    %168 = arith.subf %134, %167 : vector<8x16xf32>
    %169 = math.tanh %168 : vector<8x16xf32>
    %170 = arith.addf %165, %169 : vector<8x16xf32>
    %171 = vector.extract_strided_slice %132 {offsets = [0, 7], sizes = [8, 1], strides = [1, 1]} : vector<8x16xf32> to vector<8x1xf32>
    %172 = vector.broadcast %171 : vector<8x1xf32> to vector<8x16xf32>
    %173 = arith.subf %134, %172 : vector<8x16xf32>
    %174 = math.tanh %173 : vector<8x16xf32>
    %175 = arith.addf %170, %174 : vector<8x16xf32>
    %176 = vector.extract_strided_slice %132 {offsets = [0, 8], sizes = [8, 1], strides = [1, 1]} : vector<8x16xf32> to vector<8x1xf32>
    %177 = vector.broadcast %176 : vector<8x1xf32> to vector<8x16xf32>
    %178 = arith.subf %134, %177 : vector<8x16xf32>
    %179 = math.tanh %178 : vector<8x16xf32>
    %180 = arith.addf %175, %179 : vector<8x16xf32>
    %181 = vector.extract_strided_slice %132 {offsets = [0, 9], sizes = [8, 1], strides = [1, 1]} : vector<8x16xf32> to vector<8x1xf32>
    %182 = vector.broadcast %181 : vector<8x1xf32> to vector<8x16xf32>
    %183 = arith.subf %134, %182 : vector<8x16xf32>
    %184 = math.tanh %183 : vector<8x16xf32>
    %185 = arith.addf %180, %184 : vector<8x16xf32>
    %186 = vector.extract_strided_slice %132 {offsets = [0, 10], sizes = [8, 1], strides = [1, 1]} : vector<8x16xf32> to vector<8x1xf32>
    %187 = vector.broadcast %186 : vector<8x1xf32> to vector<8x16xf32>
    %188 = arith.subf %134, %187 : vector<8x16xf32>
    %189 = math.tanh %188 : vector<8x16xf32>
    %190 = arith.addf %185, %189 : vector<8x16xf32>
    %191 = vector.extract_strided_slice %132 {offsets = [0, 11], sizes = [8, 1], strides = [1, 1]} : vector<8x16xf32> to vector<8x1xf32>
    %192 = vector.broadcast %191 : vector<8x1xf32> to vector<8x16xf32>
    %193 = arith.subf %134, %192 : vector<8x16xf32>
    %194 = math.tanh %193 : vector<8x16xf32>
    %195 = arith.addf %190, %194 : vector<8x16xf32>
    %196 = vector.extract_strided_slice %132 {offsets = [0, 12], sizes = [8, 1], strides = [1, 1]} : vector<8x16xf32> to vector<8x1xf32>
    %197 = vector.broadcast %196 : vector<8x1xf32> to vector<8x16xf32>
    %198 = arith.subf %134, %197 : vector<8x16xf32>
    %199 = math.tanh %198 : vector<8x16xf32>
    %200 = arith.addf %195, %199 : vector<8x16xf32>
    %201 = vector.extract_strided_slice %132 {offsets = [0, 13], sizes = [8, 1], strides = [1, 1]} : vector<8x16xf32> to vector<8x1xf32>
    %202 = vector.broadcast %201 : vector<8x1xf32> to vector<8x16xf32>
    %203 = arith.subf %134, %202 : vector<8x16xf32>
    %204 = math.tanh %203 : vector<8x16xf32>
    %205 = arith.addf %200, %204 : vector<8x16xf32>
    %206 = vector.extract_strided_slice %132 {offsets = [0, 14], sizes = [8, 1], strides = [1, 1]} : vector<8x16xf32> to vector<8x1xf32>
    %207 = vector.broadcast %206 : vector<8x1xf32> to vector<8x16xf32>
    %208 = arith.subf %134, %207 : vector<8x16xf32>
    %209 = math.tanh %208 : vector<8x16xf32>
    %210 = arith.addf %205, %209 : vector<8x16xf32>
    %211 = vector.extract_strided_slice %132 {offsets = [0, 15], sizes = [8, 1], strides = [1, 1]} : vector<8x16xf32> to vector<8x1xf32>
    %212 = vector.broadcast %211 : vector<8x1xf32> to vector<8x16xf32>
    %213 = arith.subf %134, %212 : vector<8x16xf32>
    %214 = math.tanh %213 : vector<8x16xf32>
    %215 = arith.addf %210, %214 : vector<8x16xf32>
    %216 = vector.broadcast %3 : f32 to vector<8x16xf32>
    %217 = arith.mulf %216, %215 : vector<8x16xf32>
    %218 = vector.broadcast %4 : f32 to vector<8x16xf32>
    %219 = arith.addf %217, %218 : vector<8x16xf32>
    %220 = arith.negf %219 : vector<8x16xf32>
    %221 = math.exp %220 : vector<8x16xf32>
    %cst_14 = arith.constant 1.000000e+00 : f32
    %222 = vector.broadcast %cst_14 : f32 to vector<8x16xf32>
    %223 = arith.addf %222, %221 : vector<8x16xf32>
    %224 = arith.divf %222, %223 : vector<8x16xf32>
    %cst_15 = arith.constant 1.600000e+01 : f32
    %225 = vector.broadcast %cst_15 : f32 to vector<8x16xf32>
    %226 = arith.mulf %225, %224 : vector<8x16xf32>
    %227 = arith.truncf %226 : vector<8x16xf32> to vector<8x16xbf16>
    %cst_16 = arith.constant dense<0.000000e+00> : vector<8x16xf32>
    %228 = tpu.matmul %227, %11, %cst_16 {dimension_numbers = #tpu.dot_dimension_numbers<[1], [0], [0], [1], [0, 0, 1, 1], [], []>} : vector<8x16xbf16>, vector<16x16xbf16>, vector<8x16xf32> -> vector<8x16xf32>
    %229 = vector.broadcast %0 : f32 to vector<8x16xf32>
    %230 = arith.mulf %229, %228 : vector<8x16xf32>
    %231 = vector.broadcast %1 : f32 to vector<8x16xf32>
    %232 = arith.mulf %231, %226 : vector<8x16xf32>
    %233 = arith.addf %230, %232 : vector<8x16xf32>
    %234 = vector.broadcast %2 : f32 to vector<8x16xf32>
    %235 = arith.addf %233, %234 : vector<8x16xf32>
    %236 = arith.truncf %235 : vector<8x16xf32> to vector<8x16xbf16>
    %237 = arith.extf %236 : vector<8x16xbf16> to vector<8x16xf32>
    %cst_17 = arith.constant 1.000000e+03 : f32
    %238 = vector.broadcast %cst_17 : f32 to vector<8x16xf32>
    %239 = arith.mulf %238, %237 : vector<8x16xf32>
    %cst_18 = arith.constant 5.000000e+00 : f32
    %240 = vector.broadcast %cst_18 : f32 to vector<8x16xf32>
    %241 = arith.subf %239, %240 : vector<8x16xf32>
    %cst_19 = arith.constant 0.000000e+00 : f32
    %242 = vector.broadcast %cst_19 : f32 to vector<8x16xf32>
    %243 = vector.extract_strided_slice %239 {offsets = [0, 0], sizes = [8, 1], strides = [1, 1]} : vector<8x16xf32> to vector<8x1xf32>
    %244 = vector.broadcast %243 : vector<8x1xf32> to vector<8x16xf32>
    %245 = arith.subf %241, %244 : vector<8x16xf32>
    %246 = math.tanh %245 : vector<8x16xf32>
    %247 = arith.addf %242, %246 : vector<8x16xf32>
    %248 = vector.extract_strided_slice %239 {offsets = [0, 1], sizes = [8, 1], strides = [1, 1]} : vector<8x16xf32> to vector<8x1xf32>
    %249 = vector.broadcast %248 : vector<8x1xf32> to vector<8x16xf32>
    %250 = arith.subf %241, %249 : vector<8x16xf32>
    %251 = math.tanh %250 : vector<8x16xf32>
    %252 = arith.addf %247, %251 : vector<8x16xf32>
    %253 = vector.extract_strided_slice %239 {offsets = [0, 2], sizes = [8, 1], strides = [1, 1]} : vector<8x16xf32> to vector<8x1xf32>
    %254 = vector.broadcast %253 : vector<8x1xf32> to vector<8x16xf32>
    %255 = arith.subf %241, %254 : vector<8x16xf32>
    %256 = math.tanh %255 : vector<8x16xf32>
    %257 = arith.addf %252, %256 : vector<8x16xf32>
    %258 = vector.extract_strided_slice %239 {offsets = [0, 3], sizes = [8, 1], strides = [1, 1]} : vector<8x16xf32> to vector<8x1xf32>
    %259 = vector.broadcast %258 : vector<8x1xf32> to vector<8x16xf32>
    %260 = arith.subf %241, %259 : vector<8x16xf32>
    %261 = math.tanh %260 : vector<8x16xf32>
    %262 = arith.addf %257, %261 : vector<8x16xf32>
    %263 = vector.extract_strided_slice %239 {offsets = [0, 4], sizes = [8, 1], strides = [1, 1]} : vector<8x16xf32> to vector<8x1xf32>
    %264 = vector.broadcast %263 : vector<8x1xf32> to vector<8x16xf32>
    %265 = arith.subf %241, %264 : vector<8x16xf32>
    %266 = math.tanh %265 : vector<8x16xf32>
    %267 = arith.addf %262, %266 : vector<8x16xf32>
    %268 = vector.extract_strided_slice %239 {offsets = [0, 5], sizes = [8, 1], strides = [1, 1]} : vector<8x16xf32> to vector<8x1xf32>
    %269 = vector.broadcast %268 : vector<8x1xf32> to vector<8x16xf32>
    %270 = arith.subf %241, %269 : vector<8x16xf32>
    %271 = math.tanh %270 : vector<8x16xf32>
    %272 = arith.addf %267, %271 : vector<8x16xf32>
    %273 = vector.extract_strided_slice %239 {offsets = [0, 6], sizes = [8, 1], strides = [1, 1]} : vector<8x16xf32> to vector<8x1xf32>
    %274 = vector.broadcast %273 : vector<8x1xf32> to vector<8x16xf32>
    %275 = arith.subf %241, %274 : vector<8x16xf32>
    %276 = math.tanh %275 : vector<8x16xf32>
    %277 = arith.addf %272, %276 : vector<8x16xf32>
    %278 = vector.extract_strided_slice %239 {offsets = [0, 7], sizes = [8, 1], strides = [1, 1]} : vector<8x16xf32> to vector<8x1xf32>
    %279 = vector.broadcast %278 : vector<8x1xf32> to vector<8x16xf32>
    %280 = arith.subf %241, %279 : vector<8x16xf32>
    %281 = math.tanh %280 : vector<8x16xf32>
    %282 = arith.addf %277, %281 : vector<8x16xf32>
    %283 = vector.extract_strided_slice %239 {offsets = [0, 8], sizes = [8, 1], strides = [1, 1]} : vector<8x16xf32> to vector<8x1xf32>
    %284 = vector.broadcast %283 : vector<8x1xf32> to vector<8x16xf32>
    %285 = arith.subf %241, %284 : vector<8x16xf32>
    %286 = math.tanh %285 : vector<8x16xf32>
    %287 = arith.addf %282, %286 : vector<8x16xf32>
    %288 = vector.extract_strided_slice %239 {offsets = [0, 9], sizes = [8, 1], strides = [1, 1]} : vector<8x16xf32> to vector<8x1xf32>
    %289 = vector.broadcast %288 : vector<8x1xf32> to vector<8x16xf32>
    %290 = arith.subf %241, %289 : vector<8x16xf32>
    %291 = math.tanh %290 : vector<8x16xf32>
    %292 = arith.addf %287, %291 : vector<8x16xf32>
    %293 = vector.extract_strided_slice %239 {offsets = [0, 10], sizes = [8, 1], strides = [1, 1]} : vector<8x16xf32> to vector<8x1xf32>
    %294 = vector.broadcast %293 : vector<8x1xf32> to vector<8x16xf32>
    %295 = arith.subf %241, %294 : vector<8x16xf32>
    %296 = math.tanh %295 : vector<8x16xf32>
    %297 = arith.addf %292, %296 : vector<8x16xf32>
    %298 = vector.extract_strided_slice %239 {offsets = [0, 11], sizes = [8, 1], strides = [1, 1]} : vector<8x16xf32> to vector<8x1xf32>
    %299 = vector.broadcast %298 : vector<8x1xf32> to vector<8x16xf32>
    %300 = arith.subf %241, %299 : vector<8x16xf32>
    %301 = math.tanh %300 : vector<8x16xf32>
    %302 = arith.addf %297, %301 : vector<8x16xf32>
    %303 = vector.extract_strided_slice %239 {offsets = [0, 12], sizes = [8, 1], strides = [1, 1]} : vector<8x16xf32> to vector<8x1xf32>
    %304 = vector.broadcast %303 : vector<8x1xf32> to vector<8x16xf32>
    %305 = arith.subf %241, %304 : vector<8x16xf32>
    %306 = math.tanh %305 : vector<8x16xf32>
    %307 = arith.addf %302, %306 : vector<8x16xf32>
    %308 = vector.extract_strided_slice %239 {offsets = [0, 13], sizes = [8, 1], strides = [1, 1]} : vector<8x16xf32> to vector<8x1xf32>
    %309 = vector.broadcast %308 : vector<8x1xf32> to vector<8x16xf32>
    %310 = arith.subf %241, %309 : vector<8x16xf32>
    %311 = math.tanh %310 : vector<8x16xf32>
    %312 = arith.addf %307, %311 : vector<8x16xf32>
    %313 = vector.extract_strided_slice %239 {offsets = [0, 14], sizes = [8, 1], strides = [1, 1]} : vector<8x16xf32> to vector<8x1xf32>
    %314 = vector.broadcast %313 : vector<8x1xf32> to vector<8x16xf32>
    %315 = arith.subf %241, %314 : vector<8x16xf32>
    %316 = math.tanh %315 : vector<8x16xf32>
    %317 = arith.addf %312, %316 : vector<8x16xf32>
    %318 = vector.extract_strided_slice %239 {offsets = [0, 15], sizes = [8, 1], strides = [1, 1]} : vector<8x16xf32> to vector<8x1xf32>
    %319 = vector.broadcast %318 : vector<8x1xf32> to vector<8x16xf32>
    %320 = arith.subf %241, %319 : vector<8x16xf32>
    %321 = math.tanh %320 : vector<8x16xf32>
    %322 = arith.addf %317, %321 : vector<8x16xf32>
    %323 = vector.broadcast %3 : f32 to vector<8x16xf32>
    %324 = arith.mulf %323, %322 : vector<8x16xf32>
    %325 = vector.broadcast %4 : f32 to vector<8x16xf32>
    %326 = arith.addf %324, %325 : vector<8x16xf32>
    %327 = arith.negf %326 : vector<8x16xf32>
    %328 = math.exp %327 : vector<8x16xf32>
    %cst_20 = arith.constant 1.000000e+00 : f32
    %329 = vector.broadcast %cst_20 : f32 to vector<8x16xf32>
    %330 = arith.addf %329, %328 : vector<8x16xf32>
    %331 = arith.divf %329, %330 : vector<8x16xf32>
    %cst_21 = arith.constant 1.600000e+01 : f32
    %332 = vector.broadcast %cst_21 : f32 to vector<8x16xf32>
    %333 = arith.mulf %332, %331 : vector<8x16xf32>
    %334 = arith.truncf %333 : vector<8x16xf32> to vector<8x16xbf16>
    %cst_22 = arith.constant dense<0.000000e+00> : vector<8x16xf32>
    %335 = tpu.matmul %334, %11, %cst_22 {dimension_numbers = #tpu.dot_dimension_numbers<[1], [0], [0], [1], [0, 0, 1, 1], [], []>} : vector<8x16xbf16>, vector<16x16xbf16>, vector<8x16xf32> -> vector<8x16xf32>
    %336 = vector.broadcast %5 : f32 to vector<8x16xf32>
    %337 = arith.mulf %336, %335 : vector<8x16xf32>
    %338 = vector.broadcast %6 : f32 to vector<8x16xf32>
    %339 = arith.mulf %338, %333 : vector<8x16xf32>
    %340 = arith.addf %337, %339 : vector<8x16xf32>
    %341 = vector.broadcast %7 : f32 to vector<8x16xf32>
    %342 = arith.addf %340, %341 : vector<8x16xf32>
    %c0_23 = arith.constant 0 : index
    %c0_24 = arith.constant 0 : index
    %343 = vector.load %arg4[%c0_23, %c0_24] : memref<8x16xf32, #tpu.memory_space<vmem>>, vector<8x16xf32>
    tpu.vector_store %arg4[%c0_23, %c0_24], %333 {strides = array<i32>} : memref<8x16xf32, #tpu.memory_space<vmem>>, vector<8x16xf32>,
    %cst_25 = arith.constant dense<0.000000e+00> : vector<8xf32>
    %344 = vector.multi_reduction <add>, %342, %cst_25 [1] : vector<8x16xf32> to vector<8xf32>
    %345 = vector.shape_cast %344 : vector<8xf32> to vector<8x1xf32>
    %c0_26 = arith.constant 0 : index
    %c0_27 = arith.constant 0 : index
    %346 = vector.load %arg5[%c0_26, %c0_27] : memref<8x1xf32, #tpu.memory_space<vmem>>, vector<8x1xf32>
    tpu.vector_store %arg5[%c0_26, %c0_27], %345 {strides = array<i32>} : memref<8x1xf32, #tpu.memory_space<vmem>>, vector<8x1xf32>,
    return
  }
  func.func @transform_0(%arg0: i32) -> i32 {
    %c0_i32 = arith.constant 0 : i32
    %c0_i32_0 = arith.constant 0 : i32
    return %c0_i32 : i32
  }
  func.func @transform_1(%arg0: i32) -> (i32, i32) {
    %c0_i32 = arith.constant 0 : i32
    %c0_i32_0 = arith.constant 0 : i32
    return %arg0, %c0_i32 : i32, i32
  }
  func.func @transform_3(%arg0: i32) -> (i32, i32) {
    %c0_i32 = arith.constant 0 : i32
    %c0_i32_0 = arith.constant 0 : i32
    return %arg0, %c0_i32 : i32, i32
  }
  func.func @transform_4(%arg0: i32) -> (i32, i32) {
    %c0_i32 = arith.constant 0 : i32
    %c0_i32_0 = arith.constant 0 : i32
    return %arg0, %c0_i32 : i32, i32
  }
}

</mosaic_0001>

<bundles_post_ra>
// kernel: _refine_call.1
= control target key start
LH: loop header
LB: loop body
LE: loop exit
PB: predicated region body
PF: predicated region fallthrough
CT: control target
= control target key end

     0   :  { %10 = vsyncpa [#allocation6], 0  ;;  %s1222_s0 = inlined_call_operand.hbm [shape: f32[8], index: 0, kind: input, shape index: {}]   ;;  %s1223_s1 = inlined_call_operand.hbm [shape: f32[8,16], index: 1, kind: input, shape index: {}]   ;;  %s1224_s2 = inlined_call_operand.hbm [shape: bf16[16,16], index: 2, kind: input, shape index: {}]   ;;  %s1225_s3 = inlined_call_operand.hbm [shape: f32[8,16], index: 3, kind: output, shape index: {0}]   ;;  %s1226_s4 = inlined_call_operand.vmem [shape: f32[8,1], index: 4, kind: output, shape index: {1}]  }
   0x1   :  { %11 = vsyncpa [#allocation4], 0 }
   0x2   :  { %12 = vsyncpa [#allocation5], 0  ;;  %s985_s15 = smov [#allocation3]   ;;  %s986_s18 = smov [#allocation7]  }
   0x3   :  { %20 = dma.hbm_to_smem %s1222_s0, 16, %s985_s15, [#allocation6]  }
   0x4   :  { %s27_s19 = sshll.u32 %s986_s18, 4  ;;  %s28_s19 = int_to_ptr.vmem [resolvable:$true] %s27_s19 }
   0x5   :  { %s925_s20 = scalar_lea.vmem %s28_s19, 128  ;;  %p930_p1 = scmp.lt.s32.totalorder %s28_s19, %s28_s19 }
   0x6   :  { %p926_p0 = scmp.ne.s32.totalorder %s28_s19, %s925_s20  ;;  %p931_p2 = scmp.lt.s32.totalorder %s925_s20, %s925_s20 }
   0x8   :  { %p932_p3 = por %p931_p2, %p930_p1 }
   0xa   :  { %p933_p4 = pnand %p932_p3, %p926_p0 }
   0xc   :  { %936 = shalt.err (!%p933_p4)
}
   0xd   :  { %30 = dma.hbm_to_vmem [thread:$0]  %s1223_s1, 128, %s28_s19, [#allocation4]  }
   0xe   :  { %977 = dma.done.wait [#allocation6], 16  }
   0xf   :  { %978 = vsyncadd [#allocation6], 4294967280 }
  0x10   :  { %979 = dma.done.wait [#allocation4], 128  }
  0x11   :  { %980 = vsyncadd [#allocation4], 4294967168 }
  0x12   :  { %37 = sfence }
  0x13   :  { %s1038_s0 = sld [smem:[#allocation3]] }
  0x14   :  { %s1040_s23 = sld [smem:[#allocation3 + $0x1]] }
  0x15   :  { %s1042_s24 = sld [smem:[#allocation3 + $0x2]] }
  0x16   :  { %s1044_s25 = sld [smem:[#allocation3 + $0x3]] }
  0x17   :  { %s1046_s26 = sld [smem:[#allocation3 + $0x4]] }
  0x18   :  { %s1048_s27 = sld [smem:[#allocation3 + $0x5]] }
  0x19   :  { %s1050_s28 = sld [smem:[#allocation3 + $0x6]] }
  0x1a   :  { %s1052_s1 = sld [smem:[#allocation3 + $0x7]] }
  0x1b   :  { %s987_s29 = smov [#allocation2]  }
  0x1c   :  { %s58_s30 = sshll.u32 %s987_s29, 4  ;;  %s59_s30 = int_to_ptr.vmem [resolvable:$true] %s58_s30 }
  0x1d   :  { %s945_s5 = scalar_lea.vmem %s59_s30, 128  ;;  %p950_p6 = scmp.lt.s32.totalorder %s59_s30, %s59_s30 }
  0x1e   :  { %p946_p5 = scmp.ne.s32.totalorder %s59_s30, %s945_s5  ;;  %p951_p7 = scmp.lt.s32.totalorder %s945_s5, %s945_s5 }
  0x20   :  { %p952_p8 = por %p951_p7, %p950_p6 }
  0x22   :  { %p953_p9 = pnand %p952_p8, %p946_p5 }
  0x24   :  { %956 = shalt.err (!%p953_p9)  }
  0x25   :  { %61 = dma.hbm_to_vmem [thread:$0]  %s1224_s2, 128, %s59_s30, [#allocation9] }
  0x26   :  { %981 = dma.done.wait [#allocation9], 128 }
  0x27   :  { %982 = vsyncadd [#allocation9], 4294967168  ;;  %v1057_v0 = vld [vmem:[#allocation2] sm:$0xff]   ;;  %v988_v1 = vmov 0.0   ;;  %v68_v2 = vld [vmem:[#allocation7] sm:$0xff]  ;;  %vm989_vm0 = vmmov 0   ;;  %v1076_v6 = vstv %s1040_s23  ;;  %v1079_v7 = vstv %s1038_s0 }
  0x28   :  { %706 = vmatprep.subr.bf16.mxu0 %v988_v1  ;;  %712 = vmatprep.subr.bf16.mxu1 %v988_v1  ;;  %v69_v3 = vpack.c.bf16 %v68_v2, %v68_v2  ;;  %vm76_vm1 = vcmask 130048   ;;  %v990_v4 = vmov 2   ;;  %v991_v5 = vmov 0   ;;  %s1006_s2 = smov [#allocation8]  }
  0x29   :  { %707 = vmatpush3.bf16.msra.mxu0 %v1057_v0  ;;  %708 = vmatprep.mubr.msk.bf16.mxu0 %vm989_vm0, %v988_v1  ;;  %v123_v8 = vmul.f32 %v1076_v6, %v68_v2  ;;  %v1084_v11 = vstv %s1042_s24  ;;  %v992_v20 = vmov 3   ;;  %v993_v21 = vmov 1   ;;  %s666_s8 = sshll.u32 %s1006_s2, 4  ;;  %s667_s8 = int_to_ptr.vmem [resolvable:$true] %s666_s8 }
  0x2a   :  { %713 = vmatpush3.bf16.msra.mxu1 %v1057_v0  ;;  %714 = vmatprep.mubr.msk.bf16.mxu1 %vm989_vm0, %v988_v1  ;;  %v994_v22 = vmov 4   ;;  %v995_v23 = vmov 5   ;;  %v996_v24 = vmov 6   ;;  %v997_v25 = vmov 8   ;;  %s957_s9 = scalar_lea.vmem %s667_s8, 128  ;;  %p962_p11 = scmp.lt.s32.totalorder %s667_s8, %s667_s8 }
  0x2b   :  { %718 = vmatprep.subr.bf16.mxu0 %v988_v1  ;;  %724 = vmatprep.subr.bf16.mxu1 %v988_v1  ;;  %v998_v26 = vmov 7   ;;  %v999_v27 = vmov 11   ;;  %v1000_v28 = vmov 9   ;;  %v1001_v29 = vmov 14   ;;  %p958_p10 = scmp.ne.s32.totalorder %s667_s8, %s957_s9  ;;  %p963_p12 = scmp.lt.s32.totalorder %s957_s9, %s957_s9 }
  0x2c   :  { %709 = vmatmul.mubr.msk.bf16.vlgmr.msra.gmra.mxu0 %vm76_vm1, %v69_v3  ;;  %754 = vset.pattern.permute.xlu1 %v990_v4  ;;  %v1002_v30 = vmov 10   ;;  %v1003_v31 = vmov 12   ;;  %v1004_v32 = vmov 13   ;;  %v1005_v33 = vmov 15  }
  0x2d   :  { %719 = vmatpush3.bf16.msra.mxu0 %v1057_v0  ;;  %720 = vmatprep.mubr.msk.bf16.mxu0 %vm989_vm0, %v988_v1  ;;  %p964_p13 = por %p963_p12, %p962_p11 }
  0x2e   :  { %752 = vset.pattern.permute.xlu0 %v991_v5 }
  0x2f   :  { %p965_p0 = pnand %p964_p13, %p958_p10 }
  0xec   :  { %v114_v9 = vpop.f32.mrf.mxu0 }
  0xed   :  { %v121_v10 = vmul.f32 %v1079_v7, %v114_v9 }
  0xee   :  { %v710_v12 = vpop.f32.mrf.mxu0 }
  0xef   :  { %v124_v13 = vadd.f32 %v123_v8, %v121_v10 }
  0xf0   :  { %v117_v14 = vpop.f32.mrf.mxu0 }
  0xf1   :  { %v126_v15 = vadd.f32 %v1084_v11, %v124_v13 }
  0xf2   :  { %v711_v16 = vpop.f32.mrf.mxu0 }
  0xf3   :  { %v127_v17 = vpack.c.bf16 %v126_v15, %v126_v15 }
  0xf5   :  { %v128_v18 = vunpack.c.l.bf16 %v127_v17 }
  0xf7   :  { %v129_v19 = vmul.f32 1000.0, %v128_v18 }
  0xf9   :  { %147 = vperm.xlu1 %754, %v129_v19   ;;  %133 = vperm.xlu0 %752, %v129_v19   ;;  %v1103_v36 = vadd.f32 -5.0, %v129_v19 }
  0xfd   :  { %755 = vset.pattern.permute.xlu1 %v992_v20  ;;  %753 = vset.pattern.permute.xlu0 %v993_v21 }
  0xfe   :  { %154 = vperm.xlu1 %755, %v129_v19   ;;  %140 = vperm.xlu0 %753, %v129_v19  }
 0x102   :  { %756 = vset.pattern.permute.xlu1 %v994_v22  ;;  %757 = vset.pattern.permute.xlu0 %v995_v23 }
 0x103   :  { %161 = vperm.xlu1 %756, %v129_v19   ;;  %168 = vperm.xlu0 %757, %v129_v19  }
 0x107   :  { %758 = vset.pattern.permute.xlu1 %v996_v24  ;;  %760 = vset.pattern.permute.xlu0 %v997_v25 }
 0x108   :  { %175 = vperm.xlu1 %758, %v129_v19   ;;  %189 = vperm.xlu0 %760, %v129_v19  }
 0x10c   :  { %759 = vset.pattern.permute.xlu1 %v998_v26  ;;  %763 = vset.pattern.permute.xlu0 %v999_v27 }
 0x10d   :  { %182 = vperm.xlu1 %759, %v129_v19   ;;  %210 = vperm.xlu0 %763, %v129_v19  }
 0x111   :  { %761 = vset.pattern.permute.xlu1 %v1000_v28  ;;  %766 = vset.pattern.permute.xlu0 %v1001_v29 }
 0x112   :  { %196 = vperm.xlu1 %761, %v129_v19   ;;  %231 = vperm.xlu0 %766, %v129_v19  }
 0x116   :  { %762 = vset.pattern.permute.xlu1 %v1002_v30  ;;  %769 = vset.pattern.permute.xlu0 %v993_v21 }
 0x117   :  { %203 = vperm.xlu1 %762, %v129_v19  }
 0x11b   :  { %764 = vset.pattern.permute.xlu1 %v1003_v31 }
 0x11c   :  { %217 = vperm.xlu1 %764, %v129_v19  }
 0x120   :  { %765 = vset.pattern.permute.xlu1 %v1004_v32 }
 0x121   :  { %224 = vperm.xlu1 %765, %v129_v19  }
 0x125   :  { %767 = vset.pattern.permute.xlu1 %v1005_v33 }
 0x126   :  { %238 = vperm.xlu1 %767, %v129_v19  }
 0x12a   :  { %768 = vset.pattern.permute.xlu1 %v991_v5 }
 0x174   :  { %v148_v34 = vpop.permute.xlu1 %147  ;;  %v134_v35 = vpop.permute.xlu0 %133 }
 0x175   :  { %v136_v37 = vsub.f32 %v1103_v36, %v134_v35  ;;  %v150_v41 = vsub.f32 %v1103_v36, %v148_v34 }
 0x177   :  { %801 = vtanh.f32 %v136_v37 }
 0x179   :  { %v155_v38 = vpop.permute.xlu1 %154  ;;  %v141_v39 = vpop.permute.xlu0 %140 }
 0x17a   :  { %v143_v40 = vsub.f32 %v1103_v36, %v141_v39  ;;  %v157_v42 = vsub.f32 %v1103_v36, %v155_v38 }
 0x17c   :  { %803 = vtanh.f32 %v143_v40 }
 0x17d   :  { %805 = vtanh.f32 %v150_v41 }
 0x17e   :  { %v162_v43 = vpop.permute.xlu1 %161  ;;  %v169_v44 = vpop.permute.xlu0 %168  ;;  %807 = vtanh.f32 %v157_v42 }
 0x17f   :  { %v164_v45 = vsub.f32 %v1103_v36, %v162_v43  ;;  %v171_v46 = vsub.f32 %v1103_v36, %v169_v44 }
 0x181   :  { %809 = vtanh.f32 %v164_v45 }
 0x182   :  { %811 = vtanh.f32 %v171_v46 }
 0x183   :  { %v176_v47 = vpop.permute.xlu1 %175  ;;  %v190_v49 = vpop.permute.xlu0 %189 }
 0x184   :  { %v178_v48 = vsub.f32 %v1103_v36, %v176_v47  ;;  %v802_v51 = vpop.eup %801  ;;  %v192_v55 = vsub.f32 %v1103_v36, %v190_v49 }
 0x186   :  { %813 = vtanh.f32 %v178_v48 }
 0x188   :  { %v183_v50 = vpop.permute.xlu1 %182  ;;  %v211_v3 = vpop.permute.xlu0 %210 }
 0x189   :  { %v185_v52 = vsub.f32 %v1103_v36, %v183_v50  ;;  %v804_v53 = vpop.eup %803  ;;  %v213_v13 = vsub.f32 %v1103_v36, %v211_v3 }
 0x18a   :  { %v145_v54 = vadd.f32 %v804_v53, %v802_v51  ;;  %v806_v56 = vpop.eup %805 }
 0x18b   :  { %815 = vtanh.f32 %v185_v52  ;;  %v808_v57 = vpop.eup %807 }
 0x18c   :  { %v152_v58 = vadd.f32 %v806_v56, %v145_v54  ;;  %817 = vtanh.f32 %v192_v55  ;;  %v1122_v55 = vstv %s1044_s25 }
 0x18d   :  { %v197_v59 = vpop.permute.xlu1 %196  ;;  %v232_v19 = vpop.permute.xlu0 %231 }
 0x18e   :  { %v810_v60 = vpop.eup %809  ;;  %v199_v61 = vsub.f32 %v1103_v36, %v197_v59  ;;  %v159_v62 = vadd.f32 %v808_v57, %v152_v58  ;;  %v234_v38 = vsub.f32 %v1103_v36, %v232_v19  ;;  %v1125_v57 = vstv %s1046_s26 }
 0x18f   :  { %v812_v2 = vpop.eup %811 }
 0x190   :  { %v166_v63 = vadd.f32 %v810_v60, %v159_v62  ;;  %819 = vtanh.f32 %v199_v61 }
 0x192   :  { %v204_v8 = vpop.permute.xlu1 %203  ;;  %v173_v9 = vadd.f32 %v812_v2, %v166_v63 }
 0x193   :  { %v206_v10 = vsub.f32 %v1103_v36, %v204_v8  ;;  %v814_v12 = vpop.eup %813 }
 0x194   :  { %v180_v14 = vadd.f32 %v814_v12, %v173_v9 }
 0x195   :  { %821 = vtanh.f32 %v206_v10 }
 0x196   :  { %823 = vtanh.f32 %v213_v13 }
 0x197   :  { %v218_v15 = vpop.permute.xlu1 %217 }
 0x198   :  { %v816_v16 = vpop.eup %815  ;;  %v220_v17 = vsub.f32 %v1103_v36, %v218_v15 }
 0x199   :  { %v187_v18 = vadd.f32 %v816_v16, %v180_v14  ;;  %v818_v34 = vpop.eup %817 }
 0x19a   :  { %825 = vtanh.f32 %v220_v17 }
 0x19b   :  { %v194_v37 = vadd.f32 %v818_v34, %v187_v18 }
 0x19c   :  { %v225_v35 = vpop.permute.xlu1 %224 }
 0x19d   :  { %v227_v39 = vsub.f32 %v1103_v36, %v225_v35  ;;  %v820_v40 = vpop.eup %819 }
 0x19e   :  { %v201_v41 = vadd.f32 %v820_v40, %v194_v37 }
 0x19f   :  { %827 = vtanh.f32 %v227_v39 }
 0x1a0   :  { %829 = vtanh.f32 %v234_v38 }
 0x1a1   :  { %v239_v42 = vpop.permute.xlu1 %238 }
 0x1a2   :  { %v822_v43 = vpop.eup %821  ;;  %v241_v44 = vsub.f32 %v1103_v36, %v239_v42 }
 0x1a3   :  { %v208_v45 = vadd.f32 %v822_v43, %v201_v41  ;;  %v824_v46 = vpop.eup %823 }
 0x1a4   :  { %831 = vtanh.f32 %v241_v44 }
 0x1a5   :  { %v215_v47 = vadd.f32 %v824_v46, %v208_v45 }
 0x1a7   :  { %v826_v48 = vpop.eup %825 }
 0x1a8   :  { %v222_v49 = vadd.f32 %v826_v48, %v215_v47 }
 0x1ac   :  { %v828_v50 = vpop.eup %827 }
 0x1ad   :  { %v229_v51 = vadd.f32 %v828_v50, %v222_v49  ;;  %v830_v52 = vpop.eup %829 }
 0x1af   :  { %v236_v53 = vadd.f32 %v830_v52, %v229_v51 }
 0x1b1   :  { %v832_v54 = vpop.eup %831 }
 0x1b2   :  { %v243_v56 = vadd.f32 %v832_v54, %v236_v53 }
 0x1b4   :  { %v245_v58 = vmul.f32 %v1122_v55, %v243_v56 }
 0x1b6   :  { %v247_v36 = vadd.f32 %v1125_v57, %v245_v58 }
 0x1b8   :  { %v690_v59 = vmul.f32 -1.442695, %v247_v36 }
 0x1ba   :  { %833 = vpow2.f32 %v690_v59 }
 0x1c7   :  { %v834_v60 = vpop.eup %833 }
 0x1c8   :  { %v251_v61 = vadd.f32 1.0, %v834_v60 }
 0x1ca   :  { %835 = vrcp.f32 %v251_v61 }
 0x1d7   :  { %v836_v62 = vpop.eup %835 }
 0x1d8   :  { %v254_v63 = vmul.f32 16.0, %v836_v62 }
 0x1da   :  { %v255_v2 = vpack.c.bf16 %v254_v63, %v254_v63  ;;  %v300_v9 = vmul.f32 %v254_v63, %v1076_v6 }
 0x1dc   :  { %715 = vmatmul.mubr.msk.bf16.vlgmr.msra.gmra.mxu1 %vm76_vm1, %v255_v2 }
 0x1dd   :  { %725 = vmatpush3.bf16.msra.mxu1 %v1057_v0  ;;  %726 = vmatprep.mubr.msk.bf16.mxu1 %vm989_vm0, %v988_v1 }
 0x29c   :  { %v293_v3 = vpop.f32.mrf.mxu1 }
 0x29d   :  { %v299_v8 = vmul.f32 %v293_v3, %v1079_v7 }
 0x29e   :  { %v716_v10 = vpop.f32.mrf.mxu1 }
 0x29f   :  { %v301_v12 = vadd.f32 %v300_v9, %v299_v8 }
 0x2a0   :  { %v296_v13 = vpop.f32.mrf.mxu1 }
 0x2a1   :  { %v302_v14 = vadd.f32 %v301_v12, %v1084_v11 }
 0x2a2   :  { %v717_v15 = vpop.f32.mrf.mxu1 }
 0x2a3   :  { %v303_v16 = vpack.c.bf16 %v302_v14, %v302_v14 }
 0x2a5   :  { %v304_v17 = vunpack.c.l.bf16 %v303_v16 }
 0x2a7   :  { %v305_v18 = vmul.f32 1000.0, %v304_v17 }
 0x2a9   :  { %316 = vperm.xlu0 %769, %v305_v18   ;;  %309 = vperm.xlu1 %768, %v305_v18  }
 0x2ad   :  { %772 = vset.pattern.permute.xlu0 %v994_v22  ;;  %770 = vset.pattern.permute.xlu1 %v990_v4 }
 0x2ae   :  { %337 = vperm.xlu0 %772, %v305_v18   ;;  %323 = vperm.xlu1 %770, %v305_v18  }
 0x2b2   :  { %775 = vset.pattern.permute.xlu0 %v998_v26  ;;  %771 = vset.pattern.permute.xlu1 %v992_v20 }
 0x2b3   :  { %358 = vperm.xlu0 %775, %v305_v18   ;;  %330 = vperm.xlu1 %771, %v305_v18  }
 0x2b7   :  { %778 = vset.pattern.permute.xlu0 %v1002_v30  ;;  %773 = vset.pattern.permute.xlu1 %v995_v23 }
 0x2b8   :  { %379 = vperm.xlu0 %778, %v305_v18   ;;  %344 = vperm.xlu1 %773, %v305_v18  }
 0x2bc   :  { %781 = vset.pattern.permute.xlu0 %v1004_v32  ;;  %774 = vset.pattern.permute.xlu1 %v996_v24 }
 0x2bd   :  { %400 = vperm.xlu0 %781, %v305_v18   ;;  %351 = vperm.xlu1 %774, %v305_v18  }
 0x2c1   :  { %776 = vset.pattern.permute.xlu1 %v997_v25  ;;  %784 = vset.pattern.permute.xlu0 %v991_v5  ;;  %v1152_v5 = vadd.f32 -5.0, %v305_v18 }
 0x2c2   :  { %365 = vperm.xlu1 %776, %v305_v18  }
 0x2c6   :  { %777 = vset.pattern.permute.xlu1 %v1000_v28 }
 0x2c7   :  { %372 = vperm.xlu1 %777, %v305_v18  }
 0x2cb   :  { %779 = vset.pattern.permute.xlu1 %v999_v27 }
 0x2cc   :  { %386 = vperm.xlu1 %779, %v305_v18  }
 0x2d0   :  { %780 = vset.pattern.permute.xlu1 %v1003_v31 }
 0x2d1   :  { %393 = vperm.xlu1 %780, %v305_v18  }
 0x2d5   :  { %782 = vset.pattern.permute.xlu1 %v1001_v29 }
 0x2d6   :  { %407 = vperm.xlu1 %782, %v305_v18  }
 0x2da   :  { %783 = vset.pattern.permute.xlu1 %v1005_v33 }
 0x2db   :  { %414 = vperm.xlu1 %783, %v305_v18  }
 0x2df   :  { %785 = vset.pattern.permute.xlu1 %v993_v21 }
 0x324   :  { %v317_v0 = vpop.permute.xlu0 %316  ;;  %v310_v1 = vpop.permute.xlu1 %309 }
 0x325   :  { %v319_v19 = vsub.f32 %v1152_v5, %v317_v0  ;;  %v312_v34 = vsub.f32 %v1152_v5, %v310_v1 }
 0x327   :  { %837 = vtanh.f32 %v319_v19 }
 0x328   :  { %839 = vtanh.f32 %v312_v34 }
 0x329   :  { %v324_v35 = vpop.permute.xlu1 %323  ;;  %v338_v39 = vpop.permute.xlu0 %337 }
 0x32a   :  { %v326_v37 = vsub.f32 %v1152_v5, %v324_v35  ;;  %v340_v21 = vsub.f32 %v1152_v5, %v338_v39 }
 0x32c   :  { %841 = vtanh.f32 %v326_v37 }
 0x32e   :  { %v331_v38 = vpop.permute.xlu1 %330  ;;  %v359_v44 = vpop.permute.xlu0 %358 }
 0x32f   :  { %v333_v40 = vsub.f32 %v1152_v5, %v331_v38  ;;  %v361_v49 = vsub.f32 %v1152_v5, %v359_v44 }
 0x331   :  { %843 = vtanh.f32 %v333_v40 }
 0x332   :  { %845 = vtanh.f32 %v340_v21 }
 0x333   :  { %v345_v41 = vpop.permute.xlu1 %344  ;;  %v380_v58 = vpop.permute.xlu0 %379 }
 0x334   :  { %v347_v42 = vsub.f32 %v1152_v5, %v345_v41  ;;  %v838_v43 = vpop.eup %837  ;;  %v382_v63 = vsub.f32 %v1152_v5, %v380_v58 }
 0x335   :  { %v840_v46 = vpop.eup %839 }
 0x336   :  { %847 = vtanh.f32 %v347_v42  ;;  %v321_v50 = vadd.f32 %v840_v46, %v838_v43 }
 0x338   :  { %v352_v45 = vpop.permute.xlu1 %351  ;;  %v401_v13 = vpop.permute.xlu0 %400 }
 0x339   :  { %v354_v47 = vsub.f32 %v1152_v5, %v352_v45  ;;  %v842_v48 = vpop.eup %841  ;;  %v403_v18 = vsub.f32 %v1152_v5, %v401_v13 }
 0x33a   :  { %v328_v52 = vadd.f32 %v842_v48, %v321_v50 }
 0x33b   :  { %849 = vtanh.f32 %v354_v47 }
 0x33c   :  { %851 = vtanh.f32 %v361_v49 }
 0x33d   :  { %v366_v51 = vpop.permute.xlu1 %365 }
 0x33e   :  { %v368_v53 = vsub.f32 %v1152_v5, %v366_v51  ;;  %v844_v54 = vpop.eup %843 }
 0x33f   :  { %v335_v56 = vadd.f32 %v844_v54, %v328_v52  ;;  %v846_v59 = vpop.eup %845 }
 0x340   :  { %853 = vtanh.f32 %v368_v53 }
 0x341   :  { %v342_v61 = vadd.f32 %v846_v59, %v335_v56 }
 0x342   :  { %v373_v36 = vpop.permute.xlu1 %372 }
 0x343   :  { %v375_v60 = vsub.f32 %v1152_v5, %v373_v36  ;;  %v848_v62 = vpop.eup %847 }
 0x344   :  { %v349_v3 = vadd.f32 %v848_v62, %v342_v61 }
 0x345   :  { %855 = vtanh.f32 %v375_v60 }
 0x346   :  { %857 = vtanh.f32 %v382_v63 }
 0x347   :  { %v387_v2 = vpop.permute.xlu1 %386 }
 0x348   :  { %v389_v8 = vsub.f32 %v1152_v5, %v387_v2  ;;  %v850_v9 = vpop.eup %849 }
 0x349   :  { %v356_v10 = vadd.f32 %v850_v9, %v349_v3  ;;  %v852_v12 = vpop.eup %851 }
 0x34a   :  { %859 = vtanh.f32 %v389_v8 }
 0x34b   :  { %v363_v15 = vadd.f32 %v852_v12, %v356_v10 }
 0x34c   :  { %v394_v14 = vpop.permute.xlu1 %393 }
 0x34d   :  { %v396_v16 = vsub.f32 %v1152_v5, %v394_v14  ;;  %v854_v17 = vpop.eup %853 }
 0x34e   :  { %v370_v0 = vadd.f32 %v854_v17, %v363_v15 }
 0x34f   :  { %861 = vtanh.f32 %v396_v16 }
 0x350   :  { %863 = vtanh.f32 %v403_v18 }
 0x351   :  { %v408_v1 = vpop.permute.xlu1 %407 }
 0x352   :  { %v856_v19 = vpop.eup %855  ;;  %v410_v34 = vsub.f32 %v1152_v5, %v408_v1 }
 0x353   :  { %v377_v35 = vadd.f32 %v856_v19, %v370_v0  ;;  %v858_v37 = vpop.eup %857 }
 0x354   :  { %865 = vtanh.f32 %v410_v34 }
 0x355   :  { %v384_v39 = vadd.f32 %v858_v37, %v377_v35 }
 0x356   :  { %v415_v38 = vpop.permute.xlu1 %414 }
 0x357   :  { %v417_v40 = vsub.f32 %v1152_v5, %v415_v38  ;;  %v860_v21 = vpop.eup %859 }
 0x358   :  { %v391_v41 = vadd.f32 %v860_v21, %v384_v39 }
 0x359   :  { %867 = vtanh.f32 %v417_v40 }
 0x35c   :  { %v862_v42 = vpop.eup %861 }
 0x35d   :  { %v398_v43 = vadd.f32 %v862_v42, %v391_v41  ;;  %v864_v44 = vpop.eup %863 }
 0x35f   :  { %v405_v45 = vadd.f32 %v864_v44, %v398_v43 }
 0x361   :  { %v866_v46 = vpop.eup %865 }
 0x362   :  { %v412_v47 = vadd.f32 %v866_v46, %v405_v45 }
 0x366   :  { %v868_v48 = vpop.eup %867 }
 0x367   :  { %v419_v49 = vadd.f32 %v868_v48, %v412_v47 }
 0x369   :  { %v420_v50 = vmul.f32 %v419_v49, %v1122_v55 }
 0x36b   :  { %v421_v51 = vadd.f32 %v420_v50, %v1125_v57 }
 0x36d   :  { %v693_v52 = vmul.f32 -1.442695, %v421_v51 }
 0x36f   :  { %869 = vpow2.f32 %v693_v52 }
 0x37c   :  { %v870_v53 = vpop.eup %869 }
 0x37d   :  { %v425_v54 = vadd.f32 1.0, %v870_v53 }
 0x37f   :  { %871 = vrcp.f32 %v425_v54 }
 0x38c   :  { %v872_v5 = vpop.eup %871 }
 0x38d   :  { %v428_v56 = vmul.f32 16.0, %v872_v5 }
 0x38f   :  { %v429_v58 = vpack.c.bf16 %v428_v56, %v428_v56  ;;  %v474_v60 = vmul.f32 %v428_v56, %v1076_v6 }
 0x391   :  { %721 = vmatmul.mubr.msk.bf16.vlgmr.msra.gmra.mxu0 %vm76_vm1, %v429_v58 }
 0x451   :  { %v467_v36 = vpop.f32.mrf.mxu0 }
 0x452   :  { %v473_v59 = vmul.f32 %v467_v36, %v1079_v7 }
 0x453   :  { %v722_v61 = vpop.f32.mrf.mxu0 }
 0x454   :  { %v475_v62 = vadd.f32 %v474_v60, %v473_v59 }
 0x455   :  { %v470_v63 = vpop.f32.mrf.mxu0 }
 0x456   :  { %v476_v2 = vadd.f32 %v475_v62, %v1084_v11 }
 0x457   :  { %v723_v3 = vpop.f32.mrf.mxu0 }
 0x458   :  { %v477_v8 = vpack.c.bf16 %v476_v2, %v476_v2 }
 0x45a   :  { %v478_v9 = vunpack.c.l.bf16 %v477_v8 }
 0x45c   :  { %v479_v10 = vmul.f32 1000.0, %v478_v9 }
 0x45e   :  { %490 = vperm.xlu1 %785, %v479_v10   ;;  %483 = vperm.xlu0 %784, %v479_v10  }
 0x462   :  { %786 = vset.pattern.permute.xlu1 %v990_v4  ;;  %787 = vset.pattern.permute.xlu0 %v992_v20  ;;  %v1190_v4 = vadd.f32 -5.0, %v479_v10 }
 0x463   :  { %497 = vperm.xlu1 %786, %v479_v10   ;;  %504 = vperm.xlu0 %787, %v479_v10  }
 0x467   :  { %788 = vset.pattern.permute.xlu1 %v994_v22  ;;  %790 = vset.pattern.permute.xlu0 %v996_v24 }
 0x468   :  { %511 = vperm.xlu1 %788, %v479_v10   ;;  %525 = vperm.xlu0 %790, %v479_v10  }
 0x46c   :  { %789 = vset.pattern.permute.xlu1 %v995_v23  ;;  %793 = vset.pattern.permute.xlu0 %v1000_v28 }
 0x46d   :  { %518 = vperm.xlu1 %789, %v479_v10   ;;  %546 = vperm.xlu0 %793, %v479_v10  }
 0x471   :  { %791 = vset.pattern.permute.xlu1 %v998_v26  ;;  %796 = vset.pattern.permute.xlu0 %v1003_v31 }
 0x472   :  { %532 = vperm.xlu1 %791, %v479_v10   ;;  %567 = vperm.xlu0 %796, %v479_v10  }
 0x476   :  { %792 = vset.pattern.permute.xlu1 %v997_v25  ;;  %799 = vset.pattern.permute.xlu0 %v1005_v33 }
 0x477   :  { %539 = vperm.xlu1 %792, %v479_v10   ;;  %588 = vperm.xlu0 %799, %v479_v10  }
 0x47b   :  { %794 = vset.pattern.permute.xlu1 %v1002_v30 }
 0x47c   :  { %553 = vperm.xlu1 %794, %v479_v10  }
 0x480   :  { %795 = vset.pattern.permute.xlu1 %v999_v27 }
 0x481   :  { %560 = vperm.xlu1 %795, %v479_v10  }
 0x485   :  { %797 = vset.pattern.permute.xlu1 %v1004_v32 }
 0x486   :  { %574 = vperm.xlu1 %797, %v479_v10  }
 0x48a   :  { %798 = vset.pattern.permute.xlu1 %v1001_v29 }
 0x48b   :  { %581 = vperm.xlu1 %798, %v479_v10  }
 0x4d9   :  { %v491_v6 = vpop.permute.xlu1 %490  ;;  %v484_v7 = vpop.permute.xlu0 %483 }
 0x4da   :  { %v493_v11 = vsub.f32 %v1190_v4, %v491_v6  ;;  %v486_v20 = vsub.f32 %v1190_v4, %v484_v7 }
 0x4dc   :  { %873 = vtanh.f32 %v493_v11 }
 0x4dd   :  { %875 = vtanh.f32 %v486_v20 }
 0x4de   :  { %v498_v22 = vpop.permute.xlu1 %497  ;;  %v505_v23 = vpop.permute.xlu0 %504 }
 0x4df   :  { %v500_v24 = vsub.f32 %v1190_v4, %v498_v22  ;;  %v507_v25 = vsub.f32 %v1190_v4, %v505_v23 }
 0x4e1   :  { %877 = vtanh.f32 %v500_v24 }
 0x4e2   :  { %879 = vtanh.f32 %v507_v25 }
 0x4e3   :  { %v512_v26 = vpop.permute.xlu1 %511  ;;  %v526_v28 = vpop.permute.xlu0 %525 }
 0x4e4   :  { %v514_v27 = vsub.f32 %v1190_v4, %v512_v26  ;;  %v528_v33 = vsub.f32 %v1190_v4, %v526_v28  ;;  %v649_v28 = vstv %s1050_s28 }
 0x4e6   :  { %881 = vtanh.f32 %v514_v27  ;;  %v647_v27 = vstv %s1048_s27 }
 0x4e8   :  { %v519_v29 = vpop.permute.xlu1 %518  ;;  %v547_v18 = vpop.permute.xlu0 %546 }
 0x4e9   :  { %v874_v30 = vpop.eup %873  ;;  %v521_v31 = vsub.f32 %v1190_v4, %v519_v29  ;;  %v549_v35 = vsub.f32 %v1190_v4, %v547_v18 }
 0x4ea   :  { %v876_v32 = vpop.eup %875 }
 0x4eb   :  { %883 = vtanh.f32 %v521_v31  ;;  %v495_v12 = vadd.f32 %v876_v32, %v874_v30 }
 0x4ec   :  { %885 = vtanh.f32 %v528_v33 }
 0x4ed   :  { %v533_v13 = vpop.permute.xlu1 %532  ;;  %v568_v42 = vpop.permute.xlu0 %567 }
 0x4ee   :  { %v878_v14 = vpop.eup %877  ;;  %v535_v15 = vsub.f32 %v1190_v4, %v533_v13  ;;  %v570_v47 = vsub.f32 %v1190_v4, %v568_v42 }
 0x4ef   :  { %v502_v16 = vadd.f32 %v878_v14, %v495_v12  ;;  %v880_v17 = vpop.eup %879 }
 0x4f0   :  { %887 = vtanh.f32 %v535_v15 }
 0x4f1   :  { %v509_v1 = vadd.f32 %v880_v17, %v502_v16 }
 0x4f2   :  { %v540_v0 = vpop.permute.xlu1 %539  ;;  %v589_v53 = vpop.permute.xlu0 %588 }
 0x4f3   :  { %v542_v19 = vsub.f32 %v1190_v4, %v540_v0  ;;  %v882_v34 = vpop.eup %881  ;;  %v591_v56 = vsub.f32 %v1190_v4, %v589_v53 }
 0x4f4   :  { %v516_v37 = vadd.f32 %v882_v34, %v509_v1 }
 0x4f5   :  { %889 = vtanh.f32 %v542_v19 }
 0x4f6   :  { %891 = vtanh.f32 %v549_v35 }
 0x4f7   :  { %v554_v38 = vpop.permute.xlu1 %553 }
 0x4f8   :  { %v884_v39 = vpop.eup %883  ;;  %v556_v40 = vsub.f32 %v1190_v4, %v554_v38 }
 0x4f9   :  { %v523_v21 = vadd.f32 %v884_v39, %v516_v37  ;;  %v886_v41 = vpop.eup %885 }
 0x4fa   :  { %893 = vtanh.f32 %v556_v40 }
 0x4fb   :  { %v530_v44 = vadd.f32 %v886_v41, %v523_v21 }
 0x4fc   :  { %v561_v43 = vpop.permute.xlu1 %560 }
 0x4fd   :  { %v563_v45 = vsub.f32 %v1190_v4, %v561_v43  ;;  %v888_v46 = vpop.eup %887 }
 0x4fe   :  { %v537_v48 = vadd.f32 %v888_v46, %v530_v44 }
 0x4ff   :  { %895 = vtanh.f32 %v563_v45 }
 0x500   :  { %897 = vtanh.f32 %v570_v47 }
 0x501   :  { %v575_v49 = vpop.permute.xlu1 %574 }
 0x502   :  { %v890_v50 = vpop.eup %889  ;;  %v577_v51 = vsub.f32 %v1190_v4, %v575_v49 }
 0x503   :  { %v544_v52 = vadd.f32 %v890_v50, %v537_v48  ;;  %v892_v54 = vpop.eup %891 }
 0x504   :  { %899 = vtanh.f32 %v577_v51 }
 0x505   :  { %v551_v58 = vadd.f32 %v892_v54, %v544_v52 }
 0x506   :  { %v582_v5 = vpop.permute.xlu1 %581 }
 0x507   :  { %v584_v36 = vsub.f32 %v1190_v4, %v582_v5  ;;  %v894_v59 = vpop.eup %893 }
 0x508   :  { %v558_v60 = vadd.f32 %v894_v59, %v551_v58 }
 0x509   :  { %901 = vtanh.f32 %v584_v36 }
 0x50a   :  { %903 = vtanh.f32 %v591_v56 }
 0x50c   :  { %v896_v61 = vpop.eup %895 }
 0x50d   :  { %v565_v62 = vadd.f32 %v896_v61, %v558_v60  ;;  %v898_v63 = vpop.eup %897 }
 0x50f   :  { %v572_v2 = vadd.f32 %v898_v63, %v565_v62 }
 0x511   :  { %v900_v3 = vpop.eup %899 }
 0x512   :  { %v579_v8 = vadd.f32 %v900_v3, %v572_v2 }
 0x516   :  { %v902_v9 = vpop.eup %901 }
 0x517   :  { %v586_v10 = vadd.f32 %v902_v9, %v579_v8  ;;  %v904_v6 = vpop.eup %903 }
 0x519   :  { %v593_v7 = vadd.f32 %v904_v6, %v586_v10 }
 0x51b   :  { %v594_v11 = vmul.f32 %v593_v7, %v1122_v55 }
 0x51d   :  { %v595_v4 = vadd.f32 %v594_v11, %v1125_v57  ;;  %v652_v57 = vstv %s1052_s1 }
 0x51f   :  { %v696_v20 = vmul.f32 -1.442695, %v595_v4 }
 0x521   :  { %905 = vpow2.f32 %v696_v20 }
 0x52e   :  { %v906_v22 = vpop.eup %905 }
 0x52f   :  { %v599_v23 = vadd.f32 1.0, %v906_v22 }
 0x531   :  { %907 = vrcp.f32 %v599_v23 }
 0x53e   :  { %v908_v24 = vpop.eup %907 }
 0x53f   :  { %v602_v25 = vmul.f32 16.0, %v908_v24 }
 0x541   :  { %v603_v26 = vpack.c.bf16 %v602_v25, %v602_v25  ;;  %654 = vst.msk [vmem:[#allocation8] sm:$0xff] %vm76_vm1, %v602_v25  ;;  %v650_v55 = vmul.f32 %v649_v28, %v602_v25 }
 0x543   :  { %727 = vmatmul.mubr.msk.bf16.vlgmr.msra.gmra.mxu1 %vm76_vm1, %v603_v26 }
 0x603   :  { %v641_v29 = vpop.f32.mrf.mxu1 }
 0x604   :  { %v648_v30 = vmul.f32 %v647_v27, %v641_v29 }
 0x605   :  { %v728_v31 = vpop.f32.mrf.mxu1 }
 0x606   :  { %v651_v32 = vadd.f32 %v650_v55, %v648_v30 }
 0x607   :  { %v644_v33 = vpop.f32.mrf.mxu1 }
 0x608   :  { %v653_v12 = vadd.f32 %v652_v57, %v651_v32 }
 0x609   :  { %v729_v13 = vpop.f32.mrf.mxu1 }
 0x60a   :  { %v655_v14 = vsel %vm76_vm1, %v653_v12, 0.0 }
 0x60b   :  { %656 = vadd.xlane.f32.xlu1 %v655_v14 }
 0x60c   :  { %968 = shalt.err (!%p965_p0)
}
 0x60d   :  { %669 = dma.vmem_to_hbm [thread:$0]  %s667_s8, 128, %s1225_s3, [#allocation5]   ;;  %vm658_vm2 = vcmask 7168  }
 0x694   :  { %v657_v15 = vpop.xlane.xlu1 %656 }
 0x695   :  { %659 = vst.msk [vmem:[%s1226_s4] sm:$0xff] %vm658_vm2, %v657_v15 }
 0x696   :  { %983 = dma.done.wait [#allocation5], 128  }
 0x697   :  { %984 = vsyncadd [#allocation5], 4294967168 }
 0x698   :  { %677 = vsyncpa [#allocation4], 1 }
 0x699   :  { %678 = vsyncpa [#allocation5], 1 }
 0x69a   :  { %679 = vsyncpa [#allocation6], 1 }

</bundles_post_ra>
